<compile_context>
chip_gen: v6e
topology: v6e:2x2x1
jax: 0.10.0
libtpu: 0.0.40
codegen_flags: <defaults>
</compile_context>

<pallas_src>
import functools

import jax
import jax.numpy as jnp
from jax import lax
from jax.experimental import pallas as pl
from jax.experimental.pallas import tpu as pltpu


def _sobelxy_flat_kernel(x_ref, ml_ref, mr_ref, o_ref, *, W, compute_dtype):
    """Separable Sobel on a block of planes with flattened spatial dims.

    x_ref, o_ref : (Bc, L) blocks, L = rows * W, row-major flattening of (rows, W).
    ml_ref/mr_ref: (1, L) multiplicative masks that zero the lane positions where
                   the +-1 lane roll wraps across a row boundary (w==0 / w==W-1).
    """
    x = x_ref[...].astype(compute_dtype)
    Bc, L = x.shape
    ml = ml_ref[...]
    mr = mr_ref[...]

    # Horizontal taps: x[., w-1] and x[., w+1] with zero padding at the edges.
    xm1 = pltpu.roll(x, 1, axis=1) * ml          # left neighbour
    xp1 = pltpu.roll(x, L - 1, axis=1) * mr      # right neighbour

    th = xm1 - xp1                               # row filter [1, 0, -1]
    tv = xm1 + 2.0 * x + xp1                     # row filter [1, 2, 1]

    # Vertical taps: roll by one image row (W lanes); zero the wrapped row.
    ridx = lax.broadcasted_iota(jnp.int32, (Bc, L), 1)
    top = ridx < W                               # first image row of the slab
    bot = ridx >= (L - W)                        # last image row of the slab

    thm = jnp.where(top, 0, pltpu.roll(th, W, axis=1))       # th[i-1]
    thp = jnp.where(bot, 0, pltpu.roll(th, L - W, axis=1))   # th[i+1]
    tvm = jnp.where(top, 0, pltpu.roll(tv, W, axis=1))       # tv[i-1]
    tvp = jnp.where(bot, 0, pltpu.roll(tv, L - W, axis=1))   # tv[i+1]

    gx = thm + 2.0 * th + thp                    # column filter [1, 2, 1]
    gy = tvm - tvp                               # column filter [1, 0, -1]

    o_ref[...] = (jnp.abs(gx) + jnp.abs(gy)).astype(o_ref.dtype)


def _round_up(n, m):
    return ((n + m - 1) // m) * m


def _pick_bc(P, per_plane_bytes, budget, n_tc):
    """Planes per grid step.  Bc must be a multiple of 8 (sublanes) or equal P."""
    if P <= 8:
        return P
    max_bc = max(8, (budget // max(per_plane_bytes, 1)) // 8 * 8)
    bc = min(max_bc, (P // 8) * 8)
    steps = -(-P // bc)
    if n_tc == 2:
        # v7x only: keep >=2 grid steps (and an even count) so both TCs stay busy.
        if steps == 1 and P >= 16:
            bc = min(bc, max(8, _round_up(-(-P // 2), 8)))
        elif steps > 1 and steps % 2 == 1:
            bc2 = _round_up(-(-P // (steps + 1)), 8)
            if 8 <= bc2 <= bc:
                bc = bc2
    return bc


def _run_flat(x2d, W, *, compute_dtype, bc, vmem_limit):
    """Run the flat kernel on x2d of shape (P, L) with L = rows * W."""
    P, L = x2d.shape
    elt = x2d.dtype.itemsize

    wcol = jnp.arange(L, dtype=jnp.int32) % W
    ml = (wcol != 0).astype(compute_dtype).reshape(1, L)       # keep unless w == 0
    mr = (wcol != W - 1).astype(compute_dtype).reshape(1, L)   # keep unless w == W-1

    grid = (pl.cdiv(P, bc),)
    kernel = functools.partial(_sobelxy_flat_kernel, W=W, compute_dtype=compute_dtype)

    return pl.pallas_call(
        kernel,
        out_shape=jax.ShapeDtypeStruct((P, L), x2d.dtype),
        grid=grid,
        in_specs=[
            pl.BlockSpec((bc, L), lambda i: (i, 0)),
            pl.BlockSpec((1, L), lambda i: (0, 0)),
            pl.BlockSpec((1, L), lambda i: (0, 0)),
        ],
        out_specs=pl.BlockSpec((bc, L), lambda i: (i, 0)),
        compiler_params=pltpu.CompilerParams(
            dimension_semantics=("parallel",),
            vmem_limit_bytes=int(vmem_limit),
        ),
        cost_estimate=pl.CostEstimate(
            flops=11 * P * L, transcendentals=0, bytes_accessed=2 * P * L * elt),
    )(x2d, ml, mr)


def sobelxy(x):
    """x: (N, C, H, W). Returns |sobel_x(x)| + |sobel_y(x)| (depthwise, padding=1)."""
    N, C, H, W = x.shape
    P = N * C
    elt = x.dtype.itemsize

    # ---- generation awareness ------------------------------------------------
    try:
        vmem_cap = pltpu.get_tpu_info().vmem_capacity_bytes
    except Exception:
        vmem_cap = 64 * 1024 * 1024                       # v7x-safe fallback
    vmem_limit = min(100 * 1024 * 1024, (3 * vmem_cap) // 4)   # ~96 MiB v5e/v6e, ~48 MiB v7x

    try:
        kind = jax.devices()[0].device_kind.lower()
    except Exception:
        kind = ""
    n_tc = 2 if "v7" in kind else 1                       # only v7x has 2 TCs / chip
    if x.dtype == jnp.bfloat16 and any(g in kind for g in ("v6", "v7")):
        compute_dtype = jnp.bfloat16                      # bf16 VALU on v6e/v7x
    else:
        compute_dtype = jnp.float32

    cbytes = jnp.dtype(compute_dtype).itemsize
    budget = (3 * vmem_limit) // 4
    # per-element VMEM: double-buffered in+out + ~6 live compute temporaries + int32 iota
    per_elem = 4 * elt + 6 * cbytes + 4
    per_plane = H * W * per_elem
    min_bc = P if P < 8 else 8

    if per_plane * min_bc <= budget:
        # ------- primary path: whole (H, W) planes, spatial dims flattened ----
        bc = _pick_bc(P, per_plane, budget, n_tc)
        out = _run_flat(x.reshape(P, H * W), W,
                        compute_dtype=compute_dtype, bc=bc, vmem_limit=vmem_limit)
        return out.reshape(N, C, H, W)

    # ------- fallback: H tiles with a 1-row halo (large planes, e.g. on v7x) --
    # TODO(synk): replace the wrapper-level pad/slice/concat halo with an in-kernel
    # halo DMA (memory_space=pl.ANY + make_async_copy) to avoid the extra HBM copies.
    rows_budget = budget // max(1, min_bc * W * per_elem)
    Th = int(max(1, min(H, rows_budget - 2)))
    n_chunks = pl.cdiv(H, Th)
    Hpad = n_chunks * Th
    xpadded = jnp.pad(x.reshape(P, H, W), ((0, 0), (1, Hpad - H + 1), (0, 0)))
    per_chunkplane = (Th + 2) * W * per_elem
    bc = _pick_bc(P, per_chunkplane, budget, n_tc) or min_bc
    pieces = []
    for j in range(n_chunks):
        sl = lax.slice_in_dim(xpadded, j * Th, j * Th + Th + 2, axis=1)   # (P, Th+2, W)
        o = _run_flat(sl.reshape(P, (Th + 2) * W), W,
                      compute_dtype=compute_dtype, bc=bc, vmem_limit=vmem_limit)
        pieces.append(o.reshape(P, Th + 2, W)[:, 1:Th + 1, :])            # drop halo rows
    out = jnp.concatenate(pieces, axis=1)[:, :H, :]
    return out.reshape(N, C, H, W)


def _reference(x, wx, wy):
    # Pure-JAX reference: grouped (depthwise) conv, NCHW, padding=1.
    C = x.shape[1]
    kx = jnp.broadcast_to(wx, (C, 1, 3, 3)).astype(x.dtype)
    ky = jnp.broadcast_to(wy, (C, 1, 3, 3)).astype(x.dtype)

    def conv(k):
        return jax.lax.conv_general_dilated(
            x, k, window_strides=(1, 1), padding=((1, 1), (1, 1)),
            dimension_numbers=("NCHW", "OIHW", "NCHW"),
            feature_group_count=C)

    return jnp.abs(conv(kx)) + jnp.abs(conv(ky))


if __name__ == "__main__":
    # The module's fixed Sobel filters (copied into every depthwise channel).
    wx = jnp.array([[1., 0., -1.],
                    [2., 0., -2.],
                    [1., 0., -1.]], dtype=jnp.float32)
    wy = wx.T  # sobel_filter.T

    key = jax.random.PRNGKey(0)
    N, C, H, W = 2, 4, 16, 16
    x = jax.random.normal(key, (N, C, H, W), dtype=jnp.float32)

    out = jax.jit(sobelxy)(x)
    out = jax.block_until_ready(out)

    ref = _reference(x, wx, wy)
    assert out.shape == (N, C, H, W)
    assert jnp.allclose(out, ref, atol=1e-5, rtol=1e-5)

    print("KERNEL_OK")
</pallas_src>

<mosaic_0001>
module attributes {stable_mosaic.version = 11 : i64} {
  func.func @_sobelxy_flat_kernel(%arg0: i32, %arg1: memref<8x256xf32, #tpu.memory_space<vmem>>, %arg2: memref<1x256xf32, #tpu.memory_space<vmem>>, %arg3: memref<1x256xf32, #tpu.memory_space<vmem>>, %arg4: memref<8x256xf32, #tpu.memory_space<vmem>>) attributes {dimension_semantics = [#tpu.dimension_semantics<parallel>], iteration_bounds = array<i64: 1>, scalar_prefetch = 0 : i64, scratch_operands = 0 : i64, tpu.core_type = #tpu.core_type<tc>, window_params = [{transform_indices = @transform_0, window_bounds = array<i64: 8, 256>}, {pipeline_mode = #tpu.pipeline_mode<synchronous>, transform_indices = @transform_1, window_bounds = array<i64: 1, 256>}, {pipeline_mode = #tpu.pipeline_mode<synchronous>, transform_indices = @transform_2, window_bounds = array<i64: 1, 256>}, {transform_indices = @transform_3, window_bounds = array<i64: 8, 256>}]} {
    %c0 = arith.constant 0 : index
    %c0_0 = arith.constant 0 : index
    %0 = vector.load %arg1[%c0, %c0_0] : memref<8x256xf32, #tpu.memory_space<vmem>>, vector<8x256xf32>
    %c0_1 = arith.constant 0 : index
    %c0_2 = arith.constant 0 : index
    %1 = vector.load %arg2[%c0_1, %c0_2] : memref<1x256xf32, #tpu.memory_space<vmem>>, vector<1x256xf32>
    %c0_3 = arith.constant 0 : index
    %c0_4 = arith.constant 0 : index
    %2 = vector.load %arg3[%c0_3, %c0_4] : memref<1x256xf32, #tpu.memory_space<vmem>>, vector<1x256xf32>
    %c1_i32 = arith.constant 1 : i32
    %3 = tpu.dynamic_rotate %0 by %c1_i32 dim 1 : vector<8x256xf32>, i32 -> vector<8x256xf32>
    %4 = vector.broadcast %1 : vector<1x256xf32> to vector<8x256xf32>
    %5 = arith.mulf %3, %4 : vector<8x256xf32>
    %c255_i32 = arith.constant 255 : i32
    %6 = tpu.dynamic_rotate %0 by %c255_i32 dim 1 : vector<8x256xf32>, i32 -> vector<8x256xf32>
    %7 = vector.broadcast %2 : vector<1x256xf32> to vector<8x256xf32>
    %8 = arith.mulf %6, %7 : vector<8x256xf32>
    %9 = arith.subf %5, %8 : vector<8x256xf32>
    %cst = arith.constant 2.000000e+00 : f32
    %10 = vector.broadcast %cst : f32 to vector<8x256xf32>
    %11 = arith.mulf %10, %0 : vector<8x256xf32>
    %12 = arith.addf %5, %11 : vector<8x256xf32>
    %13 = arith.addf %12, %8 : vector<8x256xf32>
    %14 = tpu.iota {dimensions = array<i32: 1>} : vector<8x256xi32>
    %c16_i32 = arith.constant 16 : i32
    %15 = vector.broadcast %c16_i32 : i32 to vector<8x256xi32>
    %16 = arith.cmpi slt, %14, %15 : vector<8x256xi32>
    %c240_i32 = arith.constant 240 : i32
    %17 = vector.broadcast %c240_i32 : i32 to vector<8x256xi32>
    %18 = arith.cmpi sge, %14, %17 : vector<8x256xi32>
    %c16_i32_5 = arith.constant 16 : i32
    %19 = tpu.dynamic_rotate %9 by %c16_i32_5 dim 1 : vector<8x256xf32>, i32 -> vector<8x256xf32>
    %c0_i32 = arith.constant 0 : i32
    %20 = arith.sitofp %c0_i32 : i32 to f32
    %21 = vector.broadcast %20 : f32 to vector<8x256xf32>
    %22 = arith.select %16, %21, %19 : vector<8x256xi1>, vector<8x256xf32>
    %c240_i32_6 = arith.constant 240 : i32
    %23 = tpu.dynamic_rotate %9 by %c240_i32_6 dim 1 : vector<8x256xf32>, i32 -> vector<8x256xf32>
    %c0_i32_7 = arith.constant 0 : i32
    %24 = arith.sitofp %c0_i32_7 : i32 to f32
    %25 = vector.broadcast %24 : f32 to vector<8x256xf32>
    %26 = arith.select %18, %25, %23 : vector<8x256xi1>, vector<8x256xf32>
    %c16_i32_8 = arith.constant 16 : i32
    %27 = tpu.dynamic_rotate %13 by %c16_i32_8 dim 1 : vector<8x256xf32>, i32 -> vector<8x256xf32>
    %c0_i32_9 = arith.constant 0 : i32
    %28 = arith.sitofp %c0_i32_9 : i32 to f32
    %29 = vector.broadcast %28 : f32 to vector<8x256xf32>
    %30 = arith.select %16, %29, %27 : vector<8x256xi1>, vector<8x256xf32>
    %c240_i32_10 = arith.constant 240 : i32
    %31 = tpu.dynamic_rotate %13 by %c240_i32_10 dim 1 : vector<8x256xf32>, i32 -> vector<8x256xf32>
    %c0_i32_11 = arith.constant 0 : i32
    %32 = arith.sitofp %c0_i32_11 : i32 to f32
    %33 = vector.broadcast %32 : f32 to vector<8x256xf32>
    %34 = arith.select %18, %33, %31 : vector<8x256xi1>, vector<8x256xf32>
    %cst_12 = arith.constant 2.000000e+00 : f32
    %35 = vector.broadcast %cst_12 : f32 to vector<8x256xf32>
    %36 = arith.mulf %35, %9 : vector<8x256xf32>
    %37 = arith.addf %22, %36 : vector<8x256xf32>
    %38 = arith.addf %37, %26 : vector<8x256xf32>
    %39 = arith.subf %30, %34 : vector<8x256xf32>
    %40 = math.absf %38 : vector<8x256xf32>
    %41 = math.absf %39 : vector<8x256xf32>
    %42 = arith.addf %40, %41 : vector<8x256xf32>
    %c0_13 = arith.constant 0 : index
    %c0_14 = arith.constant 0 : index
    %43 = vector.load %arg4[%c0_13, %c0_14] : memref<8x256xf32, #tpu.memory_space<vmem>>, vector<8x256xf32>
    tpu.vector_store %arg4[%c0_13, %c0_14], %42 {strides = array<i32>} : memref<8x256xf32, #tpu.memory_space<vmem>>, vector<8x256xf32>,
    return
  }
  func.func @transform_0(%arg0: i32) -> (i32, i32) {
    %c0_i32 = arith.constant 0 : i32
    %c0_i32_0 = arith.constant 0 : i32
    return %arg0, %c0_i32 : i32, i32
  }
  func.func @transform_1(%arg0: i32) -> (i32, i32) {
    %c0_i32 = arith.constant 0 : i32
    %c0_i32_0 = arith.constant 0 : i32
    %c0_i32_1 = arith.constant 0 : i32
    return %c0_i32, %c0_i32_0 : i32, i32
  }
  func.func @transform_2(%arg0: i32) -> (i32, i32) {
    %c0_i32 = arith.constant 0 : i32
    %c0_i32_0 = arith.constant 0 : i32
    %c0_i32_1 = arith.constant 0 : i32
    return %c0_i32, %c0_i32_0 : i32, i32
  }
  func.func @transform_3(%arg0: i32) -> (i32, i32) {
    %c0_i32 = arith.constant 0 : i32
    %c0_i32_0 = arith.constant 0 : i32
    return %arg0, %c0_i32 : i32, i32
  }
}

</mosaic_0001>

<bundles_post_ra>
// kernel: sobelxy.1
= control target key start
LH: loop header
LB: loop body
LE: loop exit
PB: predicated region body
PF: predicated region fallthrough
CT: control target
= control target key end

     0   :  { %s130_s14 = smov 127   ;;  %s131_s15 = smov 1   ;;  %v22_v2 = vlaneseq  ;;  %s201_s0 = inlined_call_operand.vmem [shape: f32[8,256], index: 0, kind: input, shape index: {}]   ;;  %s202_s2 = inlined_call_operand.vmem [shape: f32[1,256], index: 2, kind: input, shape index: {}]   ;;  %s203_s1 = inlined_call_operand.vmem [shape: f32[1,256], index: 1, kind: input, shape index: {}]   ;;  %s204_s3 = inlined_call_operand.vmem [shape: f32[8,256], index: 3, kind: output, shape index: {}]  }
   0x1   :  { %v14_v0 = vld [vmem:[%s201_s0] sm:$0xff]  ;;  %v15_v1 = vld [vmem:[%s201_s0 + $0x8] sm:$0xff]  ;;  %s132_s0 = smov 16  }
   0x2   :  { %40 = vrot.lane.b32.xlu1 %v14_v0, %s130_s14  ;;  %18 = vrot.lane.b32.xlu0 %v14_v0, %s131_s15  ;;  %v29_v3 = vshrl.u32 %v22_v2, 7  ;;  %v160_v4 = vand.u32 127, %v22_v2  ;;  %v17_v7 = vld [vmem:[%s202_s2] sm:$0x3]  ;;  %v62_v25 = vmul.f32 2.0, %v14_v0  ;;  %v63_v26 = vmul.f32 2.0, %v15_v1 }
   0x3   :  { %v16_v8 = vld [vmem:[%s203_s1] sm:$0x3]  ;;  %s133_s1 = smov 112  }
   0x4   :  { %v30_v5 = vsub.s32 0, %v29_v3  ;;  %v34_v6 = vsub.s32 1, %v29_v3  ;;  %vm44_vm0 = vcmp.lt.s32.totalorder %v160_v4, 127  ;;  %vm24_vm1 = vcmp.lt.s32.totalorder %v160_v4, 1 }
   0x5   :  { %vm69_vm2 = vcmp.lt.s32.totalorder %v160_v4, 16  ;;  %v68_v36 = vadd.s32 128, %v160_v4  ;;  %vm85_vm3 = vcmp.lt.s32.totalorder %v160_v4, 112 }
   0x6   :  { %42 = vrot.lane.b32.xlu1 %v15_v1, %s130_s14  ;;  %20 = vrot.lane.b32.xlu0 %v15_v1, %s131_s15  ;;  %v51_v11 = vrot.slane %v17_v7, %v30_v5  ;;  %v55_v12 = vrot.slane %v17_v7, %v34_v6  ;;  %v31_v13 = vrot.slane %v16_v8, %v30_v5 }
   0x7   :  { %v35_v14 = vrot.slane %v16_v8, %v34_v6  ;;  %vm72_vm4 = vcmp.ge.s32.totalorder %v68_v36, 240 }
  0x74   :  { %v41_v9 = vpop.permute.xlu1 %40  ;;  %v19_v10 = vpop.permute.xlu0 %18 }
  0x78   :  { %v43_v15 = vpop.permute.xlu1 %42  ;;  %v21_v16 = vpop.permute.xlu0 %20 }
  0x79   :  { %v45_v17 = vsel %vm44_vm0, %v41_v9, %v43_v15  ;;  %v46_v18 = vsel %vm44_vm0, %v43_v15, %v41_v9  ;;  %v25_v19 = vsel %vm24_vm1, %v19_v10, %v21_v16  ;;  %v26_v20 = vsel %vm24_vm1, %v21_v16, %v19_v10 }
  0x7a   :  { %v58_v21 = vmul.f32 %v51_v11, %v45_v17  ;;  %v59_v22 = vmul.f32 %v55_v12, %v46_v18  ;;  %v38_v23 = vmul.f32 %v31_v13, %v26_v20  ;;  %v39_v24 = vmul.f32 %v35_v14, %v25_v19 }
  0x7c   :  { %v60_v27 = vsub.f32 %v38_v23, %v58_v21  ;;  %v61_v28 = vsub.f32 %v39_v24, %v59_v22  ;;  %v64_v29 = vadd.f32 %v62_v25, %v38_v23  ;;  %v65_v30 = vadd.f32 %v63_v26, %v39_v24 }
  0x7e   :  { %73 = vrot.lane.b32.xlu0 %v60_v27, %s132_s0  ;;  %75 = vrot.lane.b32.xlu1 %v61_v28, %s132_s0  ;;  %v67_v31 = vadd.f32 %v65_v30, %v59_v22  ;;  %v66_v32 = vadd.f32 %v64_v29, %v58_v21  ;;  %v106_v40 = vmul.f32 2.0, %v60_v27  ;;  %v107_v46 = vmul.f32 2.0, %v61_v28 }
  0x82   :  { %81 = vrot.lane.b32.xlu0 %v60_v27, %s133_s1  ;;  %83 = vrot.lane.b32.xlu1 %v61_v28, %s133_s1 }
  0x86   :  { %92 = vrot.lane.b32.xlu1 %v67_v31, %s132_s0  ;;  %90 = vrot.lane.b32.xlu0 %v66_v32, %s132_s0 }
  0x8a   :  { %100 = vrot.lane.b32.xlu1 %v67_v31, %s133_s1  ;;  %98 = vrot.lane.b32.xlu0 %v66_v32, %s133_s1 }
  0xf0   :  { %v74_v33 = vpop.permute.xlu0 %73  ;;  %v76_v34 = vpop.permute.xlu1 %75 }
  0xf1   :  { %v78_v35 = vsel %vm69_vm2, %v76_v34, %v74_v33  ;;  %v77_v42 = vsel %vm69_vm2, %v74_v33, %v76_v34 }
  0xf2   :  { %v79_v39 = vsel %vm69_vm2, 0.0, %v78_v35  ;;  %v109_v50 = vadd.f32 %v107_v46, %v77_v42 }
  0xf3   :  { %v108_v43 = vadd.f32 %v106_v40, %v79_v39 }
  0xf4   :  { %v82_v37 = vpop.permute.xlu0 %81  ;;  %v84_v38 = vpop.permute.xlu1 %83 }
  0xf5   :  { %v87_v41 = vsel %vm85_vm3, %v84_v38, %v82_v37  ;;  %v86_v47 = vsel %vm85_vm3, %v82_v37, %v84_v38 }
  0xf6   :  { %v89_v48 = vsel %vm72_vm4, 0.0, %v87_v41  ;;  %v110_v51 = vadd.f32 %v108_v43, %v86_v47 }
  0xf7   :  { %v111_v54 = vadd.f32 %v109_v50, %v89_v48 }
  0xf8   :  { %v93_v44 = vpop.permute.xlu1 %92  ;;  %v91_v45 = vpop.permute.xlu0 %90  ;;  %v114_v62 = vand.u32 2147483647, %v110_v51 }
  0xf9   :  { %v95_v49 = vsel %vm69_vm2, %v93_v44, %v91_v45  ;;  %v94_v58 = vsel %vm69_vm2, %v91_v45, %v93_v44  ;;  %v115_v0 = vand.u32 2147483647, %v111_v54 }
  0xfa   :  { %v96_v55 = vsel %vm69_vm2, 0.0, %v95_v49 }
  0xfc   :  { %v101_v52 = vpop.permute.xlu1 %100  ;;  %v99_v53 = vpop.permute.xlu0 %98 }
  0xfd   :  { %v102_v56 = vsel %vm85_vm3, %v99_v53, %v101_v52  ;;  %v103_v57 = vsel %vm85_vm3, %v101_v52, %v99_v53 }
  0xfe   :  { %v105_v59 = vsel %vm72_vm4, 0.0, %v103_v57  ;;  %v112_v60 = vsub.f32 %v96_v55, %v102_v56 }
  0xff   :  { %v113_v61 = vsub.f32 %v94_v58, %v105_v59 }
 0x100   :  { %v116_v63 = vand.u32 2147483647, %v112_v60 }
 0x101   :  { %v117_v1 = vand.u32 2147483647, %v113_v61 }
 0x102   :  { %v118_v2 = vadd.f32 %v116_v63, %v114_v62 }
 0x103   :  { %v119_v3 = vadd.f32 %v117_v1, %v115_v0 }
 0x104   :  { %120 = vst [vmem:[%s204_s3] sm:$0xff] %v118_v2 }
 0x105   :  { %121 = vst [vmem:[%s204_s3 + $0x8] sm:$0xff] %v119_v3 }

</bundles_post_ra>
